<compile_context>
chip_gen: v5e
topology: v5e:2x2
jax: 0.10.0
libtpu: 0.0.40
codegen_flags: <defaults>
</compile_context>

<pallas_src>
import math
import functools

import jax
import jax.numpy as jnp
from jax.experimental import pallas as pl
from jax.experimental.pallas import tpu as pltpu


def _round_up(x, m):
    return ((x + m - 1) // m) * m


def _swimmer_actor_kernel(obs_t_ref, w_ref, wt_ref, b_ref, act_ref, *,
                          action_size, timestep_transform):
    """One batch tile, feature-major.

    obs_t_ref: [obs_dim, TB]   (lanes = batch -> fully lane-dense)
    w_ref:     [A, A]          (= W^T, VMEM-resident across tiles)
    wt_ref:    [A, 1]
    b_ref:     [A, 1]
    act_ref:   [A, TB]         (lane-dense output slab)
    """
    obs_t = obs_t_ref[...]                                    # [D, TB] f32
    obs_dim = obs_t.shape[0]

    # --- joint position normalization + clamp (same op order as reference) ---
    joint_limit = 2.0 * math.pi / (action_size + 1)
    joint_pos = jnp.clip(obs_t[:action_size, :] / joint_limit, -1.0, 1.0)   # [A, TB]

    # --- timestep affine transform (trace-time Python constants) -------------
    low_in, high_in, low_out, high_out = timestep_transform
    ts = obs_t[obs_dim - 1:obs_dim, :]                         # [1, TB]
    ts = (ts - low_in) / (high_in - low_in) * (high_out - low_out) + low_out

    # --- synthetic swimmer head (tanh-linear), transposed orientation --------
    # pre[a, b] = sum_k W[k, a] * joint_pos[b, k]  -> standard (A,A)x(A,TB) matmul.
    pre = jnp.dot(w_ref[...], joint_pos, preferred_element_type=jnp.float32)  # [A, TB]
    pre = pre + wt_ref[...] * ts + b_ref[...]                  # broadcasts: [A,1]*[1,TB]
    act_ref[...] = jnp.tanh(pre)                               # EUP


def swimmer_actor_forward(observations, w, w_t, b, *, action_size,
                          timestep_transform=(-1.0, 1.0, 0.0, 1000.0),
                          block_batch=None):
    """observations: [B, obs_dim]; w: [A, A]; w_t, b: [1, A]. Returns [B, A]."""
    batch, obs_dim = observations.shape

    # Batch tile = lane extent of each grid step. Multiple of 128 for lane-dense blocks,
    # capped at 2048 rows (per-tile VMEM ~ a few hundred KiB, fine on v5e/v6e/v7x).
    if block_batch is None:
        block_batch = min(2048, _round_up(batch, 128))
    assert block_batch % 128 == 0
    b_pad = _round_up(batch, block_batch)

    obs = observations
    if b_pad != batch:
        obs = jnp.pad(obs, ((0, b_pad - batch), (0, 0)))
    obs_t = obs.T                                              # [D, B_pad] layout plumbing
    w_tr = w.T                                                 # [A, A]
    wt_col = w_t.reshape(1, action_size).T                     # [A, 1]
    b_col = b.reshape(1, action_size).T                        # [A, 1]

    kernel = functools.partial(
        _swimmer_actor_kernel,
        action_size=action_size,
        timestep_transform=timestep_transform,
    )
    grid = (b_pad // block_batch,)

    out_t = pl.pallas_call(
        kernel,
        out_shape=jax.ShapeDtypeStruct((action_size, b_pad), jnp.float32),
        grid=grid,
        in_specs=[
            pl.BlockSpec((obs_dim, block_batch), lambda i: (0, i)),        # obs tile
            pl.BlockSpec((action_size, action_size), lambda i: (0, 0)),    # W^T (resident)
            pl.BlockSpec((action_size, 1), lambda i: (0, 0)),              # w_t^T (resident)
            pl.BlockSpec((action_size, 1), lambda i: (0, 0)),              # b^T  (resident)
        ],
        out_specs=pl.BlockSpec((action_size, block_batch), lambda i: (0, i)),
        compiler_params=pltpu.CompilerParams(
            dimension_semantics=("parallel",)),                # batch tiles independent
        cost_estimate=pl.CostEstimate(
            flops=2 * action_size * action_size * b_pad + 8 * action_size * b_pad,
            transcendentals=action_size * b_pad,
            bytes_accessed=4 * (obs_dim * b_pad + 2 * action_size * b_pad)),
    )(obs_t, w_tr, wt_col, b_col)

    return out_t[:, :batch].T                                   # back to [B, A]


def reference_forward(observations, w, w_t, b, *, action_size,
                      timestep_transform=(-1.0, 1.0, 0.0, 1000.0)):
    """Pure-JAX reference mirroring the PyTorch forward."""
    joint_pos = observations[..., :action_size]
    timesteps = observations[..., -1, None]
    joint_limit = 2 * math.pi / (action_size + 1)
    joint_pos = jnp.clip(joint_pos / joint_limit, -1.0, 1.0)
    low_in, high_in, low_out, high_out = timestep_transform
    timesteps = (timesteps - low_in) / (high_in - low_in) * (high_out - low_out) + low_out
    pre = joint_pos @ w + timesteps * w_t + b
    return jnp.tanh(pre)


if __name__ == "__main__":
    # Small shapes consistent with the module: an 8-joint swimmer, 16-feature observation
    # with the timestep appended last.
    batch = 8
    action_size = 8
    obs_dim = 16

    key = jax.random.PRNGKey(0)
    k_obs, k_t, k_w, k_wt, k_b = jax.random.split(key, 5)

    obs = jax.random.normal(k_obs, (batch, obs_dim), dtype=jnp.float32)
    raw_t = jax.random.uniform(k_t, (batch,), minval=-1.0, maxval=1.0, dtype=jnp.float32)
    obs = obs.at[:, -1].set(raw_t)

    # Deterministic synthetic swimmer-head parameters.
    w = 0.1 * jax.random.normal(k_w, (action_size, action_size), dtype=jnp.float32)
    w_t = 0.001 * jax.random.normal(k_wt, (1, action_size), dtype=jnp.float32)
    b = 0.05 * jax.random.normal(k_b, (1, action_size), dtype=jnp.float32)

    # Single-tile path.
    actions = swimmer_actor_forward(obs, w, w_t, b, action_size=action_size)
    actions = jax.block_until_ready(actions)
    expected = reference_forward(obs, w, w_t, b, action_size=action_size)
    assert actions.shape == (batch, action_size)
    assert jnp.allclose(actions, expected, atol=1e-5, rtol=1e-5), "mismatch vs reference"

    # Multi-tile + ragged-tail path (grid=3, last tile partially padded).
    batch2 = 300
    k_obs2, k_t2 = jax.random.split(jax.random.PRNGKey(1), 2)
    obs2 = jax.random.normal(k_obs2, (batch2, obs_dim), dtype=jnp.float32)
    raw_t2 = jax.random.uniform(k_t2, (batch2,), minval=-1.0, maxval=1.0, dtype=jnp.float32)
    obs2 = obs2.at[:, -1].set(raw_t2)
    actions2 = swimmer_actor_forward(obs2, w, w_t, b, action_size=action_size,
                                     block_batch=128)
    actions2 = jax.block_until_ready(actions2)
    expected2 = reference_forward(obs2, w, w_t, b, action_size=action_size)
    assert actions2.shape == (batch2, action_size)
    assert jnp.allclose(actions2, expected2, atol=1e-5, rtol=1e-5), "mismatch vs reference (tiled)"

    print("KERNEL_OK")
</pallas_src>

<mosaic_0001>
module attributes {stable_mosaic.version = 11 : i64} {
  func.func @_swimmer_actor_kernel(%arg0: i32, %arg1: memref<16x128xf32, #tpu.memory_space<vmem>>, %arg2: memref<8x8xf32, #tpu.memory_space<vmem>>, %arg3: memref<8x1xf32, #tpu.memory_space<vmem>>, %arg4: memref<8x1xf32, #tpu.memory_space<vmem>>, %arg5: memref<8x128xf32, #tpu.memory_space<vmem>>) attributes {dimension_semantics = [#tpu.dimension_semantics<parallel>], iteration_bounds = array<i64: 1>, scalar_prefetch = 0 : i64, scratch_operands = 0 : i64, tpu.core_type = #tpu.core_type<tc>, window_params = [{transform_indices = @transform_0, window_bounds = array<i64: 16, 128>}, {pipeline_mode = #tpu.pipeline_mode<synchronous>, transform_indices = @transform_1, window_bounds = array<i64: 8, 8>}, {pipeline_mode = #tpu.pipeline_mode<synchronous>, transform_indices = @transform_2, window_bounds = array<i64: 8, 1>}, {pipeline_mode = #tpu.pipeline_mode<synchronous>, transform_indices = @transform_3, window_bounds = array<i64: 8, 1>}, {transform_indices = @transform_4, window_bounds = array<i64: 8, 128>}]} {
    %c0 = arith.constant 0 : index
    %c0_0 = arith.constant 0 : index
    %0 = vector.load %arg1[%c0, %c0_0] : memref<16x128xf32, #tpu.memory_space<vmem>>, vector<16x128xf32>
    %1 = vector.extract_strided_slice %0 {offsets = [0, 0], sizes = [8, 128], strides = [1, 1]} : vector<16x128xf32> to vector<8x128xf32>
    %cst = arith.constant 0.69813168 : f32
    %2 = vector.broadcast %cst : f32 to vector<8x128xf32>
    %3 = arith.divf %1, %2 : vector<8x128xf32>
    %cst_1 = arith.constant -1.000000e+00 : f32
    %cst_2 = arith.constant 1.000000e+00 : f32
    %4 = vector.broadcast %cst_1 : f32 to vector<8x128xf32>
    %5 = arith.maximumf %4, %3 : vector<8x128xf32>
    %6 = vector.broadcast %cst_2 : f32 to vector<8x128xf32>
    %7 = arith.minimumf %6, %5 : vector<8x128xf32>
    %8 = vector.extract_strided_slice %0 {offsets = [15, 0], sizes = [1, 128], strides = [1, 1]} : vector<16x128xf32> to vector<1x128xf32>
    %cst_3 = arith.constant -1.000000e+00 : f32
    %9 = vector.broadcast %cst_3 : f32 to vector<1x128xf32>
    %10 = arith.subf %8, %9 : vector<1x128xf32>
    %cst_4 = arith.constant 2.000000e+00 : f32
    %11 = vector.broadcast %cst_4 : f32 to vector<1x128xf32>
    %12 = arith.divf %10, %11 : vector<1x128xf32>
    %cst_5 = arith.constant 1.000000e+03 : f32
    %13 = vector.broadcast %cst_5 : f32 to vector<1x128xf32>
    %14 = arith.mulf %12, %13 : vector<1x128xf32>
    %cst_6 = arith.constant 0.000000e+00 : f32
    %15 = vector.broadcast %cst_6 : f32 to vector<1x128xf32>
    %16 = arith.addf %14, %15 : vector<1x128xf32>
    %c0_7 = arith.constant 0 : index
    %c0_8 = arith.constant 0 : index
    %17 = vector.load %arg2[%c0_7, %c0_8] : memref<8x8xf32, #tpu.memory_space<vmem>>, vector<8x8xf32>
    %cst_9 = arith.constant dense<0.000000e+00> : vector<8x128xf32>
    %18 = tpu.matmul %17, %7, %cst_9 {dimension_numbers = #tpu.dot_dimension_numbers<[1], [0], [0], [1], [0, 0, 1, 1], [], []>} : vector<8x8xf32>, vector<8x128xf32>, vector<8x128xf32> -> vector<8x128xf32>
    %c0_10 = arith.constant 0 : index
    %c0_11 = arith.constant 0 : index
    %19 = vector.load %arg3[%c0_10, %c0_11] : memref<8x1xf32, #tpu.memory_space<vmem>>, vector<8x1xf32>
    %20 = vector.broadcast %19 : vector<8x1xf32> to vector<8x128xf32>
    %21 = vector.broadcast %16 : vector<1x128xf32> to vector<8x128xf32>
    %22 = arith.mulf %20, %21 : vector<8x128xf32>
    %23 = arith.addf %18, %22 : vector<8x128xf32>
    %c0_12 = arith.constant 0 : index
    %c0_13 = arith.constant 0 : index
    %24 = vector.load %arg4[%c0_12, %c0_13] : memref<8x1xf32, #tpu.memory_space<vmem>>, vector<8x1xf32>
    %25 = vector.broadcast %24 : vector<8x1xf32> to vector<8x128xf32>
    %26 = arith.addf %23, %25 : vector<8x128xf32>
    %27 = math.tanh %26 : vector<8x128xf32>
    %c0_14 = arith.constant 0 : index
    %c0_15 = arith.constant 0 : index
    %28 = vector.load %arg5[%c0_14, %c0_15] : memref<8x128xf32, #tpu.memory_space<vmem>>, vector<8x128xf32>
    tpu.vector_store %arg5[%c0_14, %c0_15], %27 {strides = array<i32>} : memref<8x128xf32, #tpu.memory_space<vmem>>, vector<8x128xf32>,
    return
  }
  func.func @transform_0(%arg0: i32) -> (i32, i32) {
    %c0_i32 = arith.constant 0 : i32
    %c0_i32_0 = arith.constant 0 : i32
    return %c0_i32, %arg0 : i32, i32
  }
  func.func @transform_1(%arg0: i32) -> (i32, i32) {
    %c0_i32 = arith.constant 0 : i32
    %c0_i32_0 = arith.constant 0 : i32
    %c0_i32_1 = arith.constant 0 : i32
    return %c0_i32, %c0_i32_0 : i32, i32
  }
  func.func @transform_2(%arg0: i32) -> (i32, i32) {
    %c0_i32 = arith.constant 0 : i32
    %c0_i32_0 = arith.constant 0 : i32
    %c0_i32_1 = arith.constant 0 : i32
    return %c0_i32, %c0_i32_0 : i32, i32
  }
  func.func @transform_3(%arg0: i32) -> (i32, i32) {
    %c0_i32 = arith.constant 0 : i32
    %c0_i32_0 = arith.constant 0 : i32
    %c0_i32_1 = arith.constant 0 : i32
    return %c0_i32, %c0_i32_0 : i32, i32
  }
  func.func @transform_4(%arg0: i32) -> (i32, i32) {
    %c0_i32 = arith.constant 0 : i32
    %c0_i32_0 = arith.constant 0 : i32
    return %c0_i32, %arg0 : i32, i32
  }
}

</mosaic_0001>

<bundles_post_ra>
// kernel: tpu_custom_call.1
= control target key start
LH: loop header
LB: loop body
LE: loop exit
PB: predicated region body
PF: predicated region fallthrough
CT: control target
= control target key end

     0   :  { %9 = vsyncpa [#allocation3], 0  ;;  %s229_s0 = inlined_call_operand.vmem [shape: f32[16,128], index: 0, kind: input, shape index: {}]   ;;  %s230_s1 = inlined_call_operand.hbm [shape: f32[8,8], index: 1, kind: input, shape index: {}]   ;;  %s231_s2 = inlined_call_operand.vmem [shape: f32[8,1], index: 2, kind: input, shape index: {}]   ;;  %s232_s3 = inlined_call_operand.vmem [shape: f32[8,1], index: 3, kind: input, shape index: {}]   ;;  %s233_s4 = inlined_call_operand.hbm [shape: f32[8,128], index: 4, kind: output, shape index: {}]  }
   0x1   :  { %10 = vsyncpa [#allocation4], 0  ;;  %s18_s17 = sshll.u32 %s230_s1, 4  ;;  %s181_s18 = smov [#allocation2]   ;;  %s19_s17 = int_to_ptr.hbm [resolvable:$true] %s18_s17 }
   0x2   :  { %s20_s19 = sshll.u32 %s181_s18, 4  ;;  %s21_s19 = int_to_ptr.vmem [resolvable:$true] %s20_s19 }
   0x3   :  { %23 = dma.hbm_to_vmem [thread:$0]  %s19_s17, 128, %s21_s19, [#allocation3]  }
   0x4   :  { %177 = dma.done.wait [#allocation3], 128  }
   0x5   :  { %178 = vsyncadd [#allocation3], 4294967168  ;;  %v182_v0 = vmov 0   ;;  %v183_v1 = vmov 0.6981317   ;;  %v56_v3 = vld [vmem:[%s231_s2] sm:$0xff] }
   0x6   :  { %122 = vset.pattern.permute.xlu0 %v182_v0  ;;  %123 = vrcp.f32 %v183_v1  ;;  %v88_v7 = vld [vmem:[%s232_s3] sm:$0xff]  ;;  %vm64_vm1 = vcmask 64512   ;;  %v184_v14 = vmov 2.0   ;;  %v33_v20 = vld [vmem:[%s229_s0 + $0x8] sm:$0xff]  ;;  %s185_s25 = smov [#allocation5]   ;;  %s104_s29 = sshll.u32 %s233_s4, 4  ;;  %s105_s29 = int_to_ptr.hbm [resolvable:$true] %s104_s29 }
   0x7   :  { %59 = vperm.xlu0 %122, %v56_v3   ;;  %v32_v8 = vld [vmem:[%s229_s0] sm:$0xff]  ;;  %125 = vrcp.f32 %v184_v14  ;;  %v115_v21 = vadd.f32 1.0, %v33_v20  ;;  %s102_s26 = sshll.u32 %s185_s25, 4  ;;  %s103_s26 = int_to_ptr.vmem [resolvable:$true] %s102_s26 }
   0x8   :  { %v55_v13 = vld [vmem:[#allocation2] sm:$0xff] }
   0xc   :  { %v124_v2 = vpop.eup %123 }
   0xd   :  { %v35_v4 = vmul.f32 0.6981317, %v124_v2  ;;  %vm39_vm0 = vweird.f32 %v124_v2  ;;  %v126_v15 = vpop.eup %125 }
   0xe   :  { %v46_v16 = vmul.f32 2.0, %v126_v15  ;;  %vm50_vm2 = vweird.f32 %v126_v15 }
   0xf   :  { %v36_v5 = vsub.f32 1.0, %v35_v4  ;;  %91 = vperm.xlu0 %122, %v88_v7  }
  0x10   :  { %v47_v17 = vsub.f32 1.0, %v46_v16 }
  0x11   :  { %v37_v6 = vmul.f32 %v124_v2, %v36_v5 }
  0x12   :  { %v48_v18 = vmul.f32 %v126_v15, %v47_v17 }
  0x13   :  { %v38_v9 = vadd.f32 %v124_v2, %v37_v6 }
  0x14   :  { %v49_v19 = vadd.f32 %v126_v15, %v48_v18 }
  0x15   :  { %v40_v10 = vsel %vm39_vm0, %v124_v2, %v38_v9 }
  0x16   :  { %v41_v11 = vmul.f32 %v40_v10, %v32_v8  ;;  %v51_v22 = vsel %vm50_vm2, %v126_v15, %v49_v19 }
  0x17   :  { %v52_v23 = vmul.f32 %v115_v21, %v51_v22 }
  0x18   :  { %v114_v12 = vclamps-f32 %v41_v11, 1.0 }
  0x19   :  { %v53_v24 = vmul.f32 1000.0, %v52_v23 }
  0x1a   :  { %83 = vmatpush.msra.mxu0 %v114_v12 }
  0x1b   :  { %116 = vmatmul.msk.f32.vlgmr.msra.gmra.mxu0 %vm64_vm1, %v55_v13  ;;  %v62_v26 = vperm.slane %v53_v24, 7 }
  0x79   :  { %v60_v25 = vpop.permute.xlu0 %59 }
  0x7a   :  { %v63_v27 = vmul.f32 %v62_v26, %v60_v25 }
  0x81   :  { %v92_v30 = vpop.permute.xlu0 %91 }
  0x98   :  { %v85_v28 = vpop.f32.mrf.mxu0 }
  0x99   :  { %v86_v29 = vadd.f32 %v85_v28, %v63_v27 }
  0x9b   :  { %v94_v31 = vadd.f32 %v92_v30, %v86_v29 }
  0x9d   :  { %127 = vtanh.f32 %v94_v31 }
  0xa3   :  { %v128_v32 = vpop.eup %127 }
  0xa4   :  { %96 = vst [vmem:[#allocation5] sm:$0xff] %v128_v32 }
  0xa5   :  { %107 = dma.vmem_to_hbm [thread:$0]  %s103_s26, 128, %s105_s29, [#allocation4]  }
  0xa6   :  { %179 = dma.done.wait [#allocation4], 128  }
  0xa7   :  { %180 = vsyncadd [#allocation4], 4294967168 }
  0xa8   :  { %112 = vsyncpa [#allocation3], 1 }
  0xa9   :  { %113 = vsyncpa [#allocation4], 1 }

</bundles_post_ra>
